<compile_context>
chip_gen: v6e
topology: v6e:2x2x1
jax: 0.10.0
libtpu: 0.0.40
codegen_flags: <defaults>
</compile_context>

<pallas_src>
import jax
import jax.numpy as jnp
from jax.experimental import pallas as pl
from jax.experimental.pallas import tpu as pltpu


def mlp_kernel(x_ref, w1_ref, b1_ref, w2_ref, b2_ref, o_ref):
    # fc1 + ReLU (MXU matmul, VPU bias/ReLU)
    h = jnp.dot(x_ref[...], w1_ref[...], preferred_element_type=jnp.float32)
    h = jnp.maximum(h + b1_ref[...], 0.0)          # (tm, H) + (1, H) broadcast
    # fc2
    y = jnp.dot(h, w2_ref[...], preferred_element_type=jnp.float32)
    o_ref[...] = (y + b2_ref[...]).astype(o_ref.dtype)   # (tm, O) + (1, O)


def _round_up(n, m):
    return ((n + m - 1) // m) * m


def simple_model_forward(x, w1, b1, w2, b2, *, block_batch=2048):
    """x: (B, in_dim); w1: (in_dim, hidden); b1: (1, hidden);
       w2: (hidden, out_dim); b2: (1, out_dim).  Returns (B, out_dim) f32."""
    B, in_dim = x.shape
    hidden = w1.shape[1]
    out_dim = w2.shape[1]

    # ---- batch tile selection (no host-side padding of x) -----------------
    if B <= 8:
        # One full-extent block; a block dim equal to the full array dim is
        # exempt from the sublane-multiple-of-8 rule.
        tm = B
    else:
        tm = min(block_batch, _round_up(B, 8))
        if B >= 16:
            # v7x has 2 TensorCores: keep >= 2 grid steps so the "parallel"
            # batch axis actually shards across them for moderate B.
            tm = min(tm, _round_up(pl.cdiv(B, 2), 8))
        tm = max(8, (tm // 8) * 8)
    grid = (pl.cdiv(B, tm),)
    # If tm does not divide B, the last block overruns; Pallas discards the
    # out-of-bounds rows on store, and (no batch reduction) garbage input rows
    # only ever feed those discarded output rows.

    # Advisory cost so XLA schedules around the (overhead-dominated) call.
    rows = grid[0] * tm
    flops = 2 * rows * (in_dim * hidden + hidden * out_dim)
    bytes_accessed = 4 * (
        rows * in_dim                 # x
        + in_dim * hidden + hidden    # w1, b1
        + hidden * out_dim + out_dim  # w2, b2
        + rows * out_dim)             # out

    vmem = pltpu.MemorySpace.VMEM
    out = pl.pallas_call(
        mlp_kernel,
        out_shape=jax.ShapeDtypeStruct((B, out_dim), jnp.float32),
        grid_spec=pltpu.PrefetchScalarGridSpec(
            num_scalar_prefetch=0,
            grid=grid,
            in_specs=[
                # activations: streamed per batch tile
                pl.BlockSpec((tm, in_dim), lambda i: (i, 0), memory_space=vmem),
                # parameters: same block every step -> stay VMEM-resident,
                # never re-fetched (constant index_map)
                pl.BlockSpec((in_dim, hidden), lambda i: (0, 0), memory_space=vmem),
                pl.BlockSpec((1, hidden), lambda i: (0, 0), memory_space=vmem),
                pl.BlockSpec((hidden, out_dim), lambda i: (0, 0), memory_space=vmem),
                pl.BlockSpec((1, out_dim), lambda i: (0, 0), memory_space=vmem),
            ],
            out_specs=pl.BlockSpec((tm, out_dim), lambda i: (i, 0),
                                   memory_space=vmem),
        ),
        compiler_params=pltpu.CompilerParams(
            # shard batch tiles over v7x's 2 TCs; no-op on v5e/v6e
            dimension_semantics=("parallel",),
            # explicit budget: <= scoped default on v6e/v7x (32 of 64 MiB
            # physical on v7x), raises v5e's 16 MiB default; tm=2048 blocks
            # (lane-padded, double-buffered) use ~6 MiB.
            vmem_limit_bytes=32 * 1024 * 1024,
        ),
        cost_estimate=pl.CostEstimate(
            flops=flops, transcendentals=0, bytes_accessed=bytes_accessed),
    )(x, w1, b1, w2, b2)

    return out


if __name__ == "__main__":
    input_dim, hidden_dim, output_dim = 10, 20, 2
    batch = 8

    key = jax.random.PRNGKey(0)
    kx, kw1, kb1, kw2, kb2 = jax.random.split(key, 5)

    # Deterministic parameter init (uniform like torch's default Linear init).
    bound1 = 1.0 / (input_dim ** 0.5)
    bound2 = 1.0 / (hidden_dim ** 0.5)
    w1 = jax.random.uniform(kw1, (input_dim, hidden_dim), jnp.float32, -bound1, bound1)
    b1 = jax.random.uniform(kb1, (1, hidden_dim), jnp.float32, -bound1, bound1)
    w2 = jax.random.uniform(kw2, (hidden_dim, output_dim), jnp.float32, -bound2, bound2)
    b2 = jax.random.uniform(kb2, (1, output_dim), jnp.float32, -bound2, bound2)

    x = jax.random.normal(kx, (batch, input_dim), jnp.float32)

    out = simple_model_forward(x, w1, b1, w2, b2)
    out = jax.block_until_ready(out)

    # Reference check in plain JAX.
    ref = jnp.maximum(x @ w1 + b1, 0.0) @ w2 + b2
    assert out.shape == (batch, output_dim)
    assert jnp.allclose(out, ref, atol=1e-5, rtol=1e-5)

    print("KERNEL_OK")
</pallas_src>

<mosaic_0001>
module attributes {stable_mosaic.version = 11 : i64} {
  func.func @mlp_kernel(%arg0: i32, %arg1: memref<8x10xf32, #tpu.memory_space<vmem>>, %arg2: memref<10x20xf32, #tpu.memory_space<vmem>>, %arg3: memref<1x20xf32, #tpu.memory_space<vmem>>, %arg4: memref<20x2xf32, #tpu.memory_space<vmem>>, %arg5: memref<1x2xf32, #tpu.memory_space<vmem>>, %arg6: memref<8x2xf32, #tpu.memory_space<vmem>>) attributes {dimension_semantics = [#tpu.dimension_semantics<parallel>], iteration_bounds = array<i64: 1>, scalar_prefetch = 0 : i64, scratch_operands = 0 : i64, tpu.core_type = #tpu.core_type<tc>, window_params = [{transform_indices = @transform_0, window_bounds = array<i64: 8, 10>}, {pipeline_mode = #tpu.pipeline_mode<synchronous>, transform_indices = @transform_1, window_bounds = array<i64: 10, 20>}, {pipeline_mode = #tpu.pipeline_mode<synchronous>, transform_indices = @transform_2, window_bounds = array<i64: 1, 20>}, {pipeline_mode = #tpu.pipeline_mode<synchronous>, transform_indices = @transform_3, window_bounds = array<i64: 20, 2>}, {pipeline_mode = #tpu.pipeline_mode<synchronous>, transform_indices = @transform_4, window_bounds = array<i64: 1, 2>}, {transform_indices = @transform_5, window_bounds = array<i64: 8, 2>}]} {
    %c0 = arith.constant 0 : index
    %c0_0 = arith.constant 0 : index
    %0 = vector.load %arg1[%c0, %c0_0] : memref<8x10xf32, #tpu.memory_space<vmem>>, vector<8x10xf32>
    %c0_1 = arith.constant 0 : index
    %c0_2 = arith.constant 0 : index
    %1 = vector.load %arg2[%c0_1, %c0_2] : memref<10x20xf32, #tpu.memory_space<vmem>>, vector<10x20xf32>
    %cst = arith.constant dense<0.000000e+00> : vector<8x20xf32>
    %2 = tpu.matmul %0, %1, %cst {dimension_numbers = #tpu.dot_dimension_numbers<[1], [0], [0], [1], [0, 0, 1, 1], [], []>} : vector<8x10xf32>, vector<10x20xf32>, vector<8x20xf32> -> vector<8x20xf32>
    %c0_3 = arith.constant 0 : index
    %c0_4 = arith.constant 0 : index
    %3 = vector.load %arg3[%c0_3, %c0_4] : memref<1x20xf32, #tpu.memory_space<vmem>>, vector<1x20xf32>
    %4 = vector.broadcast %3 : vector<1x20xf32> to vector<8x20xf32>
    %5 = arith.addf %2, %4 : vector<8x20xf32>
    %cst_5 = arith.constant 0.000000e+00 : f32
    %6 = vector.broadcast %cst_5 : f32 to vector<8x20xf32>
    %7 = arith.maximumf %5, %6 : vector<8x20xf32>
    %c0_6 = arith.constant 0 : index
    %c0_7 = arith.constant 0 : index
    %8 = vector.load %arg4[%c0_6, %c0_7] : memref<20x2xf32, #tpu.memory_space<vmem>>, vector<20x2xf32>
    %cst_8 = arith.constant dense<0.000000e+00> : vector<8x2xf32>
    %9 = tpu.matmul %7, %8, %cst_8 {dimension_numbers = #tpu.dot_dimension_numbers<[1], [0], [0], [1], [0, 0, 1, 1], [], []>} : vector<8x20xf32>, vector<20x2xf32>, vector<8x2xf32> -> vector<8x2xf32>
    %c0_9 = arith.constant 0 : index
    %c0_10 = arith.constant 0 : index
    %10 = vector.load %arg5[%c0_9, %c0_10] : memref<1x2xf32, #tpu.memory_space<vmem>>, vector<1x2xf32>
    %11 = vector.broadcast %10 : vector<1x2xf32> to vector<8x2xf32>
    %12 = arith.addf %9, %11 : vector<8x2xf32>
    %c0_11 = arith.constant 0 : index
    %c0_12 = arith.constant 0 : index
    %13 = vector.load %arg6[%c0_11, %c0_12] : memref<8x2xf32, #tpu.memory_space<vmem>>, vector<8x2xf32>
    tpu.vector_store %arg6[%c0_11, %c0_12], %12 {strides = array<i32>} : memref<8x2xf32, #tpu.memory_space<vmem>>, vector<8x2xf32>,
    return
  }
  func.func @transform_0(%arg0: i32) -> (i32, i32) {
    %c0_i32 = arith.constant 0 : i32
    %c0_i32_0 = arith.constant 0 : i32
    return %arg0, %c0_i32 : i32, i32
  }
  func.func @transform_1(%arg0: i32) -> (i32, i32) {
    %c0_i32 = arith.constant 0 : i32
    %c0_i32_0 = arith.constant 0 : i32
    %c0_i32_1 = arith.constant 0 : i32
    return %c0_i32, %c0_i32_0 : i32, i32
  }
  func.func @transform_2(%arg0: i32) -> (i32, i32) {
    %c0_i32 = arith.constant 0 : i32
    %c0_i32_0 = arith.constant 0 : i32
    %c0_i32_1 = arith.constant 0 : i32
    return %c0_i32, %c0_i32_0 : i32, i32
  }
  func.func @transform_3(%arg0: i32) -> (i32, i32) {
    %c0_i32 = arith.constant 0 : i32
    %c0_i32_0 = arith.constant 0 : i32
    %c0_i32_1 = arith.constant 0 : i32
    return %c0_i32, %c0_i32_0 : i32, i32
  }
  func.func @transform_4(%arg0: i32) -> (i32, i32) {
    %c0_i32 = arith.constant 0 : i32
    %c0_i32_0 = arith.constant 0 : i32
    %c0_i32_1 = arith.constant 0 : i32
    return %c0_i32, %c0_i32_0 : i32, i32
  }
  func.func @transform_5(%arg0: i32) -> (i32, i32) {
    %c0_i32 = arith.constant 0 : i32
    %c0_i32_0 = arith.constant 0 : i32
    return %arg0, %c0_i32 : i32, i32
  }
}

</mosaic_0001>

<bundles_post_ra>
// kernel: tpu_custom_call.1
= control target key start
LH: loop header
LB: loop body
LE: loop exit
PB: predicated region body
PF: predicated region fallthrough
CT: control target
= control target key end

     0   :  { %vm34_vm0 = vcmask 1041408   ;;  %v234_v0 = vmov 0.0   ;;  %vm235_vm1 = vmmov 0   ;;  %vm30_vm2 = vcmask 80896   ;;  %s293_s1 = inlined_call_operand.vmem [shape: f32[10,20], index: 1, kind: input, shape index: {}]   ;;  %s294_s0 = inlined_call_operand.vmem [shape: f32[8,10], index: 0, kind: input, shape index: {}]   ;;  %s295_s3 = inlined_call_operand.vmem [shape: f32[20,2], index: 3, kind: input, shape index: {}]   ;;  %s296_s2 = inlined_call_operand.vmem [shape: f32[1,20], index: 2, kind: input, shape index: {}]   ;;  %s297_s4 = inlined_call_operand.vmem [shape: f32[1,2], index: 4, kind: input, shape index: {}]   ;;  %s298_s5 = inlined_call_operand.vmem [shape: f32[8,2], index: 5, kind: output, shape index: {}]  }
   0x1   :  { %216 = vmatprep.subr.mxu0 %v234_v0  ;;  %v22_v1 = vld [vmem:[%s293_s1 + $0x8] sm:$0x3]  ;;  %v21_v2 = vld [vmem:[%s293_s1] sm:$0xff]  ;;  %220 = vmatprep.mubr.msk.f32.mxu0 %vm235_vm1, %v234_v0  ;;  %v111_v4 = vld [vmem:[%s295_s3 + $0x10] sm:$0xf]  ;;  %vm123_vm3 = vcmask 1043456  }
   0x2   :  { %217 = vmatpush3.msk.msra.mxu0 %vm34_vm0, %v22_v1  ;;  %v20_v3 = vld [vmem:[%s294_s0] sm:$0xff]  ;;  %223 = vmatprep.subr.mxu1 %v234_v0  ;;  %v110_v5 = vld [vmem:[%s295_s3 + $0x8] sm:$0xff]  ;;  %vm119_vm4 = vcmask 162816   ;;  %vm197_vm5 = vcmask 15360  }
   0x3   :  { %218 = vmatprep.subr.mxu0 %v234_v0  ;;  %229 = vmatprep.mubr.msk.f32.mxu1 %vm235_vm1, %v234_v0  ;;  %v109_v6 = vld [vmem:[%s295_s3] sm:$0xff] }
   0x4   :  { %219 = vmatpush3.msra.mxu0 %v21_v2  ;;  %224 = vmatpush3.msk.msra.mxu1 %vm123_vm3, %v111_v4  ;;  %v203_v7 = vld [vmem:[%s296_s2] ss:$0 sm:$0xff] }
   0x5   :  { %221 = vmatmul.mubr.msk.f32.vlgmr.msra.gmra.mxu0 %vm30_vm2, %v20_v3  ;;  %225 = vmatprep.subr.mxu1 %v234_v0  ;;  %v206_v12 = vld [vmem:[%s297_s4] ss:$0 sm:$0xff] }
   0x6   :  { %226 = vmatpush3.msra.mxu1 %v110_v5 }
   0x7   :  { %227 = vmatprep.subr.mxu1 %v234_v0 }
   0x8   :  { %228 = vmatpush3.msra.mxu1 %v109_v6 }
  0xc5   :  { %v104_v8 = vpop.f32.mrf.mxu0 }
  0xc6   :  { %v105_v9 = vadd.f32 %v203_v7, %v104_v8 }
  0xc7   :  { %v222_v10 = vpop.f32.mrf.mxu0 }
  0xc8   :  { %v108_v11 = vmax.f32 %v105_v9, 0.0 }
  0xca   :  { %230 = vmatmul.mubr.msk.f32.vlgmr.msra.gmra.mxu1 %vm119_vm4, %v108_v11 }
 0x18a   :  { %v193_v13 = vpop.f32.mrf.mxu1 }
 0x18b   :  { %v194_v14 = vadd.f32 %v206_v12, %v193_v13 }
 0x18c   :  { %v231_v15 = vpop.f32.mrf.mxu1 }
 0x18d   :  { %198 = vst.msk [vmem:[%s298_s5] sm:$0xff] %vm197_vm5, %v194_v14 }

</bundles_post_ra>
